<compile_context>
chip_gen: v5e
topology: v5e:2x2
jax: 0.10.0
libtpu: 0.0.40
codegen_flags: <defaults>
</compile_context>

<pallas_src>
import jax
import jax.numpy as jnp
from jax.experimental import pallas as pl
from jax.experimental.pallas import tpu as pltpu


def _make_kernel(pos_scale, neg_scale):
    def kernel(x_ref, b_ref, o_ref):
        # x_ref: (R, HW) tile; b_ref: (R, 1) per-row bias (broadcasts over lanes)
        v = x_ref[...] + b_ref[...]
        o_ref[...] = jnp.where(v >= 0, v * pos_scale, v * neg_scale).astype(o_ref.dtype)
    return kernel


def fused_leaky_relu_pallas(x, bias, negative_slope=0.2, scale=2 ** 0.5):
    """x: (N, C, H, W); bias: (1, C, 1, 1). Returns same shape/dtype as x."""
    N, C, H, W = x.shape
    assert bias.shape == (1, C, 1, 1)
    NC, HW = N * C, H * W

    # Lane-dense 2-D view of x (free reshape for contiguous NCHW).
    x2 = x.reshape(NC, HW)
    # Per-row bias: row r = n*C + c  ->  bias[c]. Tiny (N*C,1) array.
    b2 = jnp.broadcast_to(bias.reshape(1, C), (N, C)).reshape(NC, 1).astype(x.dtype)

    # Row-block size: target ~2 MiB per x tile (double-buffered in + out =
    # ~8 MiB of pipeline buffers, fits default scoped VMEM on all generations),
    # rounded down to a multiple of 8 sublanes.
    row_bytes = HW * x.dtype.itemsize
    target_tile_bytes = 2 * 1024 * 1024
    rows_target = max(8, (target_tile_bytes // max(1, row_bytes)) // 8 * 8)
    if NC <= rows_target:
        R = NC
        # Split into two blocks when cleanly possible so both v7x cores get work.
        if NC >= 16 and (NC // 2) % 8 == 0:
            R = NC // 2
    else:
        R = rows_target
    grid = (pl.cdiv(NC, R),)

    kernel = _make_kernel(float(scale), float(negative_slope * scale))

    out2 = pl.pallas_call(
        kernel,
        out_shape=jax.ShapeDtypeStruct((NC, HW), x.dtype),
        grid_spec=pltpu.PrefetchScalarGridSpec(
            num_scalar_prefetch=0,
            grid=grid,
            in_specs=[
                pl.BlockSpec((R, HW), lambda i: (i, 0)),
                pl.BlockSpec((R, 1), lambda i: (i, 0)),
            ],
            out_specs=pl.BlockSpec((R, HW), lambda i: (i, 0)),
        ),
        compiler_params=pltpu.CompilerParams(
            dimension_semantics=("parallel",),
            vmem_limit_bytes=32 * 1024 * 1024,
        ),
        cost_estimate=pl.CostEstimate(
            flops=3 * x.size,
            transcendentals=0,
            bytes_accessed=2 * x.size * x.dtype.itemsize + NC * x.dtype.itemsize,
        ),
    )(x2, b2)

    return out2.reshape(N, C, H, W)


class FusedLeakyReLU:
    """JAX/Pallas port of the PyTorch FusedLeakyReLU module."""

    def __init__(self, channel, negative_slope=0.2, scale=2 ** 0.5):
        # nn.Parameter(torch.zeros(1, channel, 1, 1)) -> deterministic zeros
        self.bias = jnp.zeros((1, channel, 1, 1), dtype=jnp.float32)
        self.negative_slope = negative_slope
        self.scale = scale

    def __call__(self, x):
        return fused_leaky_relu_pallas(x, self.bias, self.negative_slope, self.scale)


if __name__ == "__main__":
    key = jax.random.PRNGKey(0)
    N, C, H, W = 2, 4, 16, 16
    kx, kb = jax.random.split(key)
    x = jax.random.normal(kx, (N, C, H, W), dtype=jnp.float32)

    mod = FusedLeakyReLU(C)
    # Give the bias a deterministic nonzero value so the broadcast path is exercised.
    mod.bias = jax.random.normal(kb, (1, C, 1, 1), dtype=jnp.float32)

    out = mod(x)
    out = jax.block_until_ready(out)

    # Pure-JAX reference check (matches the PyTorch op).
    v = x + mod.bias
    ref = jnp.where(v >= 0, v, v * 0.2) * (2 ** 0.5)
    assert out.shape == x.shape and out.dtype == x.dtype
    assert jnp.allclose(out, ref, atol=1e-5, rtol=1e-5)

    print("KERNEL_OK")
</pallas_src>

<mosaic_0001>
module attributes {stable_mosaic.version = 11 : i64} {
  func.func @kernel(%arg0: i32, %arg1: memref<8x256xf32, #tpu.memory_space<vmem>>, %arg2: memref<8x1xf32, #tpu.memory_space<vmem>>, %arg3: memref<8x256xf32, #tpu.memory_space<vmem>>) attributes {dimension_semantics = [#tpu.dimension_semantics<parallel>], iteration_bounds = array<i64: 1>, scalar_prefetch = 0 : i64, scratch_operands = 0 : i64, tpu.core_type = #tpu.core_type<tc>, window_params = [{transform_indices = @transform_0, window_bounds = array<i64: 8, 256>}, {transform_indices = @transform_1, window_bounds = array<i64: 8, 1>}, {transform_indices = @transform_2, window_bounds = array<i64: 8, 256>}]} {
    %c0 = arith.constant 0 : index
    %c0_0 = arith.constant 0 : index
    %0 = vector.load %arg1[%c0, %c0_0] : memref<8x256xf32, #tpu.memory_space<vmem>>, vector<8x256xf32>
    %c0_1 = arith.constant 0 : index
    %c0_2 = arith.constant 0 : index
    %1 = vector.load %arg2[%c0_1, %c0_2] : memref<8x1xf32, #tpu.memory_space<vmem>>, vector<8x1xf32>
    %2 = vector.broadcast %1 : vector<8x1xf32> to vector<8x256xf32>
    %3 = arith.addf %0, %2 : vector<8x256xf32>
    %cst = arith.constant 0.000000e+00 : f32
    %4 = vector.broadcast %cst : f32 to vector<8x256xf32>
    %5 = arith.cmpf oge, %3, %4 : vector<8x256xf32>
    %cst_3 = arith.constant 1.41421354 : f32
    %6 = vector.broadcast %cst_3 : f32 to vector<8x256xf32>
    %7 = arith.mulf %3, %6 : vector<8x256xf32>
    %cst_4 = arith.constant 0.282842726 : f32
    %8 = vector.broadcast %cst_4 : f32 to vector<8x256xf32>
    %9 = arith.mulf %3, %8 : vector<8x256xf32>
    %10 = arith.select %5, %7, %9 : vector<8x256xi1>, vector<8x256xf32>
    %c0_5 = arith.constant 0 : index
    %c0_6 = arith.constant 0 : index
    %11 = vector.load %arg3[%c0_5, %c0_6] : memref<8x256xf32, #tpu.memory_space<vmem>>, vector<8x256xf32>
    tpu.vector_store %arg3[%c0_5, %c0_6], %10 {strides = array<i32>} : memref<8x256xf32, #tpu.memory_space<vmem>>, vector<8x256xf32>,
    return
  }
  func.func @transform_0(%arg0: i32) -> (i32, i32) {
    %c0_i32 = arith.constant 0 : i32
    %c0_i32_0 = arith.constant 0 : i32
    return %arg0, %c0_i32 : i32, i32
  }
  func.func @transform_1(%arg0: i32) -> (i32, i32) {
    %c0_i32 = arith.constant 0 : i32
    %c0_i32_0 = arith.constant 0 : i32
    return %arg0, %c0_i32 : i32, i32
  }
  func.func @transform_2(%arg0: i32) -> (i32, i32) {
    %c0_i32 = arith.constant 0 : i32
    %c0_i32_0 = arith.constant 0 : i32
    return %arg0, %c0_i32 : i32, i32
  }
}

</mosaic_0001>

<bundles_post_ra>
// kernel: tpu_custom_call.1
= control target key start
LH: loop header
LB: loop body
LE: loop exit
PB: predicated region body
PF: predicated region fallthrough
CT: control target
= control target key end

     0   :  { %7 = vsyncpa [#allocation3], 0  ;;  %s146_s0 = inlined_call_operand.hbm [shape: f32[8,256], index: 0, kind: input, shape index: {}]   ;;  %s147_s1 = inlined_call_operand.vmem [shape: f32[8,1], index: 1, kind: input, shape index: {}]   ;;  %s148_s2 = inlined_call_operand.hbm [shape: f32[8,256], index: 2, kind: output, shape index: {}]  }
   0x1   :  { %8 = vsyncpa [#allocation4], 0  ;;  %s14_s11 = sshll.u32 %s146_s0, 4  ;;  %s119_s12 = smov [#allocation2]   ;;  %s15_s11 = int_to_ptr.hbm [resolvable:$true] %s14_s11 }
   0x2   :  { %s16_s13 = sshll.u32 %s119_s12, 4  ;;  %s17_s13 = int_to_ptr.vmem [resolvable:$true] %s16_s13 }
   0x3   :  { %19 = dma.hbm_to_vmem [thread:$0]  %s15_s11, 256, %s17_s13, [#allocation3]  }
   0x4   :  { %115 = dma.done.wait [#allocation3], 256  }
   0x5   :  { %116 = vsyncadd [#allocation3], 4294967040  ;;  %v120_v0 = vmov 0   ;;  %v28_v1 = vld [vmem:[%s147_s1] sm:$0xff]  ;;  %v27_v3 = vld [vmem:[#allocation2 + $0x8] sm:$0xff]  ;;  %s121_s0 = smov [#allocation5]  }
   0x6   :  { %66 = vset.pattern.permute.xlu0 %v120_v0  ;;  %v26_v2 = vld [vmem:[#allocation2] sm:$0xff]  ;;  %s51_s16 = sshll.u32 %s121_s0, 4  ;;  %s53_s19 = sshll.u32 %s148_s2, 4  ;;  %s52_s16 = int_to_ptr.vmem [resolvable:$true] %s51_s16  ;;  %s54_s19 = int_to_ptr.hbm [resolvable:$true] %s53_s19 }
   0x7   :  { %31 = vperm.xlu0 %66, %v28_v1  }
  0x79   :  { %v32_v4 = vpop.permute.xlu0 %31 }
  0x7a   :  { %v34_v5 = vadd.f32 %v32_v4, %v26_v2  ;;  %v35_v6 = vadd.f32 %v32_v4, %v27_v3 }
  0x7c   :  { %vm36_vm0 = vcmp.ge.f32.partialorder %v34_v5, 0.0  ;;  %vm37_vm1 = vcmp.ge.f32.partialorder %v35_v6, 0.0  ;;  %v38_v7 = vmul.f32 1.4142135, %v34_v5  ;;  %v39_v8 = vmul.f32 1.4142135, %v35_v6 }
  0x7d   :  { %v40_v9 = vmul.f32 0.28284273, %v34_v5  ;;  %v41_v10 = vmul.f32 0.28284273, %v35_v6 }
  0x7f   :  { %v42_v11 = vsel %vm36_vm0, %v38_v7, %v40_v9  ;;  %v43_v12 = vsel %vm37_vm1, %v39_v8, %v41_v10 }
  0x80   :  { %44 = vst [vmem:[#allocation5] sm:$0xff] %v42_v11 }
  0x81   :  { %45 = vst [vmem:[#allocation5 + $0x8] sm:$0xff] %v43_v12 }
  0x82   :  { %56 = dma.vmem_to_hbm [thread:$0]  %s52_s16, 256, %s54_s19, [#allocation4]  }
  0x83   :  { %117 = dma.done.wait [#allocation4], 256  }
  0x84   :  { %118 = vsyncadd [#allocation4], 4294967040 }
  0x85   :  { %61 = vsyncpa [#allocation3], 1 }
  0x86   :  { %62 = vsyncpa [#allocation4], 1 }

</bundles_post_ra>
